<compile_context>
chip_gen: v7x
topology: tpu7x:2x2x1
jax: 0.10.0
libtpu: 0.0.40
codegen_flags: <defaults>
</compile_context>

<pallas_src>
import functools

import jax
import jax.numpy as jnp
from jax import lax
from jax.experimental import pallas as pl
from jax.experimental.pallas import tpu as pltpu

_LANE = 128


def _clip_loss_kernel(t_ref, v_ref, out_ref, logits_acc, s_acc,
                      *, inv_temp: float, batch: int):
    k = pl.program_id(0)
    nk = pl.num_programs(0)

    @pl.when(k == 0)
    def _init():
        logits_acc[...] = jnp.zeros_like(logits_acc)
        s_acc[...] = jnp.zeros_like(s_acc)

    t_blk = t_ref[...]                       # [B, TK] bf16
    v_blk = v_ref[...]                       # [B, TK] bf16

    dn = (((1,), (1,)), ((), ()))            # contract dim 1 of both operands
    # logits partial: t @ v.T (f32 accumulation, no explicit transpose)
    logits_acc[...] += lax.dot_general(
        t_blk, v_blk, dn, preferred_element_type=jnp.float32)
    # fused gram partial: t@t.T + v@v.T == [t|v] @ [t|v].T  (single K=2*TK matmul)
    c_blk = jnp.concatenate([t_blk, v_blk], axis=1)      # [B, 2*TK] bf16
    s_acc[...] += lax.dot_general(
        c_blk, c_blk, dn, preferred_element_type=jnp.float32)

    @pl.when(k == nk - 1)
    def _epilogue():
        logits = logits_acc[...] * inv_temp              # [B, B] f32
        s = s_acc[...] * (0.5 * inv_temp)                # [B, B] f32

        # targets = softmax(s, axis=-1)  (soft labels)
        s_max = jnp.max(s, axis=-1, keepdims=True)
        e = jnp.exp(s - s_max)
        targets = e * pl.reciprocal(
            jnp.sum(e, axis=-1, keepdims=True), approx=True)

        # logsumexp over rows / columns of logits (B-vectors, no BxB log-softmax)
        row_max = jnp.max(logits, axis=-1, keepdims=True)            # [B, 1]
        lse_row = row_max + jnp.log(
            jnp.sum(jnp.exp(logits - row_max), axis=-1, keepdims=True))
        col_max = jnp.max(logits, axis=0, keepdims=True)             # [1, B]
        lse_col = col_max + jnp.log(
            jnp.sum(jnp.exp(logits - col_max), axis=0, keepdims=True))

        # Soft-target cross entropies via the logsumexp identity:
        #   text_loss   = -(sum(T*L) - sum_i lse_row_i * rowsum(T)_i) / B
        #   vision_loss = -(sum(T*L) - sum_j lse_col_j * colsum(T)_j) / B
        tl_sum = jnp.sum(targets * logits)
        rowsum_t = jnp.sum(targets, axis=-1, keepdims=True)          # [B, 1]
        colsum_t = jnp.sum(targets, axis=0, keepdims=True)           # [1, B]
        inv_b = 1.0 / batch
        text_loss = -(tl_sum - jnp.sum(lse_row * rowsum_t)) * inv_b
        vision_loss = -(tl_sum - jnp.sum(lse_col * colsum_t)) * inv_b
        summary = 0.5 * (text_loss + vision_loss)

        # Pack the 3 scalars into one lane-dense row: single unmasked store.
        lane = lax.broadcasted_iota(jnp.int32, (1, _LANE), 1)
        out_ref[...] = jnp.where(
            lane == 0, text_loss, jnp.where(lane == 1, vision_loss, summary))


def clip_loss(text_emb: jax.Array, vision_emb: jax.Array, temperature: float = 1.0):
    """Pallas implementation of CLIPLoss.forward.

    Args:
      text_emb:   [B, D] float array.
      vision_emb: [B, D] float array.
    Returns:
      dict with scalar 'text_loss', 'vision_loss', 'summary'.
    """
    B, D = text_emb.shape
    assert vision_emb.shape == (B, D)

    # Feature-dim tile (grid reduction axis). Zero-padding D is exact: padded
    # columns contribute nothing to any of the dot products.
    tk = 512 if D > 512 else (-(-D // _LANE)) * _LANE
    d_pad = (-(-D // tk)) * tk
    nk = d_pad // tk

    # bf16 operands hit the native MXU path (accumulation stays f32 in-kernel);
    # results match an f32 reference at ~1e-3 relative level.
    t = text_emb.astype(jnp.bfloat16)
    v = vision_emb.astype(jnp.bfloat16)
    if d_pad != D:
        pad = ((0, 0), (0, d_pad - D))
        t = jnp.pad(t, pad)
        v = jnp.pad(v, pad)

    kernel = functools.partial(
        _clip_loss_kernel, inv_temp=1.0 / float(temperature), batch=B)

    # VMEM budget: 2 resident BxB f32 accumulators + double-buffered bf16
    # input tiles (2 inputs x 2 buffers x B x tk) + headroom.
    vmem_bytes = 2 * B * B * 4 + 2 * 2 * B * tk * 2 + (2 << 20)
    vmem_bytes = max(int(vmem_bytes), 16 << 20)
    # TODO(synk): for B beyond ~1.5-2k the BxB accumulators no longer fit
    # (earlier on v7x's 64 MiB VMEM); that regime needs a row-blocked grid
    # (parallel over B row tiles + two-pass column logsumexp), which would
    # also feed v7x's second TensorCore.

    grid_spec = pltpu.PrefetchScalarGridSpec(
        num_scalar_prefetch=0,
        grid=(nk,),
        in_specs=[
            pl.BlockSpec((B, tk), lambda k: (0, k)),
            pl.BlockSpec((B, tk), lambda k: (0, k)),
        ],
        out_specs=pl.BlockSpec((1, _LANE), lambda k: (0, 0)),
        scratch_shapes=[
            pltpu.VMEM((B, B), jnp.float32),   # logits accumulator
            pltpu.VMEM((B, B), jnp.float32),   # fused gram accumulator
        ],
    )

    out = pl.pallas_call(
        kernel,
        out_shape=jax.ShapeDtypeStruct((1, _LANE), jnp.float32),
        grid_spec=grid_spec,
        compiler_params=pltpu.CompilerParams(
            dimension_semantics=("arbitrary",),
            vmem_limit_bytes=vmem_bytes),
    )(t, v)

    return {
        "text_loss": out[0, 0],
        "vision_loss": out[0, 1],
        "summary": out[0, 2],
    }


if __name__ == "__main__":
    # Small deterministic example inputs: batch=8, hidden=32.
    key = jax.random.PRNGKey(0)
    k_text, k_vision = jax.random.split(key)
    B, D = 8, 32
    text_emb = jax.random.normal(k_text, (B, D), dtype=jnp.float32)
    vision_emb = jax.random.normal(k_vision, (B, D), dtype=jnp.float32)

    out = clip_loss(text_emb, vision_emb, temperature=1.0)
    out = jax.tree_util.tree_map(jax.block_until_ready, out)

    print("KERNEL_OK")
</pallas_src>

<mosaic_0001>
module attributes {stable_mosaic.version = 11 : i64} {
  func.func @_clip_loss_kernel(%arg0: i32, %arg1: memref<8x128xbf16, #tpu.memory_space<vmem>>, %arg2: memref<8x128xbf16, #tpu.memory_space<vmem>>, %arg3: memref<1x128xf32, #tpu.memory_space<vmem>>, %arg4: memref<8x8xf32, #tpu.memory_space<vmem>>, %arg5: memref<8x8xf32, #tpu.memory_space<vmem>>) attributes {dimension_semantics = [#tpu.dimension_semantics<arbitrary>], iteration_bounds = array<i64: 1>, scalar_prefetch = 0 : i64, scratch_operands = 2 : i64, tpu.core_type = #tpu.core_type<tc>, window_params = [{transform_indices = @transform_0, window_bounds = array<i64: 8, 128>}, {transform_indices = @transform_1, window_bounds = array<i64: 8, 128>}, {pipeline_mode = #tpu.pipeline_mode<synchronous>, transform_indices = @transform_2, window_bounds = array<i64: 1, 128>}]} {
    %c0_i32 = arith.constant 0 : i32
    %0 = arith.cmpi eq, %arg0, %c0_i32 : i32
    %1 = arith.extui %0 : i1 to i32
    %c0_i32_0 = arith.constant 0 : i32
    %2 = arith.cmpi ne, %1, %c0_i32_0 : i32
    scf.if %2 {
      %cst_15 = arith.constant 0.000000e+00 : f32
      %17 = vector.broadcast %cst_15 : f32 to vector<8x8xf32>
      %c0_16 = arith.constant 0 : index
      %c0_17 = arith.constant 0 : index
      %18 = vector.load %arg4[%c0_16, %c0_17] : memref<8x8xf32, #tpu.memory_space<vmem>>, vector<8x8xf32>
      tpu.vector_store %arg4[%c0_16, %c0_17], %17 {strides = array<i32>} : memref<8x8xf32, #tpu.memory_space<vmem>>, vector<8x8xf32>,
      %cst_18 = arith.constant 0.000000e+00 : f32
      %19 = vector.broadcast %cst_18 : f32 to vector<8x8xf32>
      %c0_19 = arith.constant 0 : index
      %c0_20 = arith.constant 0 : index
      %20 = vector.load %arg5[%c0_19, %c0_20] : memref<8x8xf32, #tpu.memory_space<vmem>>, vector<8x8xf32>
      tpu.vector_store %arg5[%c0_19, %c0_20], %19 {strides = array<i32>} : memref<8x8xf32, #tpu.memory_space<vmem>>, vector<8x8xf32>,
    } else {
    }
    %c0 = arith.constant 0 : index
    %c0_1 = arith.constant 0 : index
    %3 = vector.load %arg1[%c0, %c0_1] : memref<8x128xbf16, #tpu.memory_space<vmem>>, vector<8x128xbf16>
    %c0_2 = arith.constant 0 : index
    %c0_3 = arith.constant 0 : index
    %4 = vector.load %arg2[%c0_2, %c0_3] : memref<8x128xbf16, #tpu.memory_space<vmem>>, vector<8x128xbf16>
    %c0_4 = arith.constant 0 : index
    %c0_5 = arith.constant 0 : index
    %5 = vector.load %arg4[%c0_4, %c0_5] : memref<8x8xf32, #tpu.memory_space<vmem>>, vector<8x8xf32>
    %cst = arith.constant dense<0.000000e+00> : vector<8x8xf32>
    %6 = tpu.matmul %3, %4, %cst {dimension_numbers = #tpu.dot_dimension_numbers<[1], [1], [0], [0], [0, 0, 1, 0], [], []>} : vector<8x128xbf16>, vector<8x128xbf16>, vector<8x8xf32> -> vector<8x8xf32>
    %7 = arith.addf %5, %6 : vector<8x8xf32>
    %c0_6 = arith.constant 0 : index
    %c0_7 = arith.constant 0 : index
    %8 = vector.load %arg4[%c0_6, %c0_7] : memref<8x8xf32, #tpu.memory_space<vmem>>, vector<8x8xf32>
    tpu.vector_store %arg4[%c0_6, %c0_7], %7 {strides = array<i32>} : memref<8x8xf32, #tpu.memory_space<vmem>>, vector<8x8xf32>,
    %9 = tpu.concatenate %3, %4 in 1 : vector<8x128xbf16>, vector<8x128xbf16> -> vector<8x256xbf16>
    %c0_8 = arith.constant 0 : index
    %c0_9 = arith.constant 0 : index
    %10 = vector.load %arg5[%c0_8, %c0_9] : memref<8x8xf32, #tpu.memory_space<vmem>>, vector<8x8xf32>
    %cst_10 = arith.constant dense<0.000000e+00> : vector<8x8xf32>
    %11 = tpu.matmul %9, %9, %cst_10 {dimension_numbers = #tpu.dot_dimension_numbers<[1], [1], [0], [0], [0, 0, 1, 0], [], []>} : vector<8x256xbf16>, vector<8x256xbf16>, vector<8x8xf32> -> vector<8x8xf32>
    %12 = arith.addf %10, %11 : vector<8x8xf32>
    %c0_11 = arith.constant 0 : index
    %c0_12 = arith.constant 0 : index
    %13 = vector.load %arg5[%c0_11, %c0_12] : memref<8x8xf32, #tpu.memory_space<vmem>>, vector<8x8xf32>
    tpu.vector_store %arg5[%c0_11, %c0_12], %12 {strides = array<i32>} : memref<8x8xf32, #tpu.memory_space<vmem>>, vector<8x8xf32>,
    %c0_i32_13 = arith.constant 0 : i32
    %14 = arith.cmpi eq, %arg0, %c0_i32_13 : i32
    %15 = arith.extui %14 : i1 to i32
    %c0_i32_14 = arith.constant 0 : i32
    %16 = arith.cmpi ne, %15, %c0_i32_14 : i32
    scf.if %16 {
      %c0_15 = arith.constant 0 : index
      %c0_16 = arith.constant 0 : index
      %17 = vector.load %arg4[%c0_15, %c0_16] : memref<8x8xf32, #tpu.memory_space<vmem>>, vector<8x8xf32>
      %cst_17 = arith.constant 1.000000e+00 : f32
      %18 = vector.broadcast %cst_17 : f32 to vector<8x8xf32>
      %19 = arith.mulf %17, %18 : vector<8x8xf32>
      %c0_18 = arith.constant 0 : index
      %c0_19 = arith.constant 0 : index
      %20 = vector.load %arg5[%c0_18, %c0_19] : memref<8x8xf32, #tpu.memory_space<vmem>>, vector<8x8xf32>
      %cst_20 = arith.constant 5.000000e-01 : f32
      %21 = vector.broadcast %cst_20 : f32 to vector<8x8xf32>
      %22 = arith.mulf %20, %21 : vector<8x8xf32>
      %cst_21 = arith.constant dense<0xFF800000> : vector<8xf32>
      %23 = vector.multi_reduction <maximumf>, %22, %cst_21 [1] : vector<8x8xf32> to vector<8xf32>
      %24 = vector.shape_cast %23 : vector<8xf32> to vector<8x1xf32>
      %25 = vector.broadcast %24 : vector<8x1xf32> to vector<8x8xf32>
      %26 = arith.subf %22, %25 : vector<8x8xf32>
      %27 = math.exp %26 : vector<8x8xf32>
      %cst_22 = arith.constant dense<0.000000e+00> : vector<8xf32>
      %28 = vector.multi_reduction <add>, %27, %cst_22 [1] : vector<8x8xf32> to vector<8xf32>
      %29 = vector.shape_cast %28 : vector<8xf32> to vector<8x1xf32>
      %30 = tpu.reciprocal %29 {approx = true} : vector<8x1xf32> -> vector<8x1xf32>
      %31 = vector.broadcast %30 : vector<8x1xf32> to vector<8x8xf32>
      %32 = arith.mulf %27, %31 : vector<8x8xf32>
      %cst_23 = arith.constant dense<0xFF800000> : vector<8xf32>
      %33 = vector.multi_reduction <maximumf>, %19, %cst_23 [1] : vector<8x8xf32> to vector<8xf32>
      %34 = vector.shape_cast %33 : vector<8xf32> to vector<8x1xf32>
      %35 = vector.broadcast %34 : vector<8x1xf32> to vector<8x8xf32>
      %36 = arith.subf %19, %35 : vector<8x8xf32>
      %37 = math.exp %36 : vector<8x8xf32>
      %cst_24 = arith.constant dense<0.000000e+00> : vector<8xf32>
      %38 = vector.multi_reduction <add>, %37, %cst_24 [1] : vector<8x8xf32> to vector<8xf32>
      %39 = vector.shape_cast %38 : vector<8xf32> to vector<8x1xf32>
      %40 = math.log %39 : vector<8x1xf32>
      %41 = arith.addf %34, %40 : vector<8x1xf32>
      %cst_25 = arith.constant dense<0xFF800000> : vector<8xf32>
      %42 = vector.multi_reduction <maximumf>, %19, %cst_25 [0] : vector<8x8xf32> to vector<8xf32>
      %43 = vector.shape_cast %42 : vector<8xf32> to vector<1x8xf32>
      %44 = vector.broadcast %43 : vector<1x8xf32> to vector<8x8xf32>
      %45 = arith.subf %19, %44 : vector<8x8xf32>
      %46 = math.exp %45 : vector<8x8xf32>
      %cst_26 = arith.constant dense<0.000000e+00> : vector<8xf32>
      %47 = vector.multi_reduction <add>, %46, %cst_26 [0] : vector<8x8xf32> to vector<8xf32>
      %48 = vector.shape_cast %47 : vector<8xf32> to vector<1x8xf32>
      %49 = math.log %48 : vector<1x8xf32>
      %50 = arith.addf %43, %49 : vector<1x8xf32>
      %51 = arith.mulf %32, %19 : vector<8x8xf32>
      %52 = vector.shape_cast %51 : vector<8x8xf32> to vector<1x8x8xf32>
      %cst_27 = arith.constant dense<0.000000e+00> : vector<1xf32>
      %53 = vector.multi_reduction <add>, %52, %cst_27 [1, 2] : vector<1x8x8xf32> to vector<1xf32>
      %54 = vector.shape_cast %53 : vector<1xf32> to vector<1x1x1xf32>
      %55 = vector.extract %54[0, 0, 0] : f32 from vector<1x1x1xf32>
      %cst_28 = arith.constant dense<0.000000e+00> : vector<8xf32>
      %56 = vector.multi_reduction <add>, %32, %cst_28 [1] : vector<8x8xf32> to vector<8xf32>
      %57 = vector.shape_cast %56 : vector<8xf32> to vector<8x1xf32>
      %cst_29 = arith.constant dense<0.000000e+00> : vector<8xf32>
      %58 = vector.multi_reduction <add>, %32, %cst_29 [0] : vector<8x8xf32> to vector<8xf32>
      %59 = vector.shape_cast %58 : vector<8xf32> to vector<1x8xf32>
      %60 = arith.mulf %41, %57 : vector<8x1xf32>
      %61 = vector.shape_cast %60 : vector<8x1xf32> to vector<1x8x1xf32>
      %cst_30 = arith.constant dense<0.000000e+00> : vector<1xf32>
      %62 = vector.multi_reduction <add>, %61, %cst_30 [1, 2] : vector<1x8x1xf32> to vector<1xf32>
      %63 = vector.shape_cast %62 : vector<1xf32> to vector<1x1x1xf32>
      %64 = vector.extract %63[0, 0, 0] : f32 from vector<1x1x1xf32>
      %65 = arith.subf %55, %64 : f32
      %cst_31 = arith.constant 0.000000e+00 : f32
      %66 = arith.subf %cst_31, %65 : f32
      %cst_32 = arith.constant 1.250000e-01 : f32
      %67 = arith.mulf %66, %cst_32 : f32
      %68 = arith.mulf %50, %59 : vector<1x8xf32>
      %69 = vector.shape_cast %68 : vector<1x8xf32> to vector<1x1x8xf32>
      %cst_33 = arith.constant dense<0.000000e+00> : vector<1xf32>
      %70 = vector.multi_reduction <add>, %69, %cst_33 [1, 2] : vector<1x1x8xf32> to vector<1xf32>
      %71 = vector.shape_cast %70 : vector<1xf32> to vector<1x1x1xf32>
      %72 = vector.extract %71[0, 0, 0] : f32 from vector<1x1x1xf32>
      %73 = arith.subf %55, %72 : f32
      %cst_34 = arith.constant 0.000000e+00 : f32
      %74 = arith.subf %cst_34, %73 : f32
      %cst_35 = arith.constant 1.250000e-01 : f32
      %75 = arith.mulf %74, %cst_35 : f32
      %76 = arith.addf %67, %75 : f32
      %cst_36 = arith.constant 5.000000e-01 : f32
      %77 = arith.mulf %cst_36, %76 : f32
      %78 = tpu.iota {dimensions = array<i32: 1>} : vector<1x128xi32>
      %c0_i32_37 = arith.constant 0 : i32
      %79 = vector.broadcast %c0_i32_37 : i32 to vector<1x128xi32>
      %80 = arith.cmpi eq, %78, %79 : vector<1x128xi32>
      %c1_i32 = arith.constant 1 : i32
      %81 = vector.broadcast %c1_i32 : i32 to vector<1x128xi32>
      %82 = arith.cmpi eq, %78, %81 : vector<1x128xi32>
      %83 = vector.broadcast %75 : f32 to vector<1x128xf32>
      %84 = vector.broadcast %77 : f32 to vector<1x128xf32>
      %85 = arith.select %82, %83, %84 : vector<1x128xi1>, vector<1x128xf32>
      %86 = vector.broadcast %67 : f32 to vector<1x128xf32>
      %87 = arith.select %80, %86, %85 : vector<1x128xi1>, vector<1x128xf32>
      %c0_38 = arith.constant 0 : index
      %c0_39 = arith.constant 0 : index
      %88 = vector.load %arg3[%c0_38, %c0_39] : memref<1x128xf32, #tpu.memory_space<vmem>>, vector<1x128xf32>
      tpu.vector_store %arg3[%c0_38, %c0_39], %87 {strides = array<i32>} : memref<1x128xf32, #tpu.memory_space<vmem>>, vector<1x128xf32>,
    } else {
    }
    return
  }
  func.func @transform_0(%arg0: i32) -> (i32, i32) {
    %c0_i32 = arith.constant 0 : i32
    %c0_i32_0 = arith.constant 0 : i32
    return %c0_i32, %arg0 : i32, i32
  }
  func.func @transform_1(%arg0: i32) -> (i32, i32) {
    %c0_i32 = arith.constant 0 : i32
    %c0_i32_0 = arith.constant 0 : i32
    return %c0_i32, %arg0 : i32, i32
  }
  func.func @transform_2(%arg0: i32) -> (i32, i32) {
    %c0_i32 = arith.constant 0 : i32
    %c0_i32_0 = arith.constant 0 : i32
    %c0_i32_1 = arith.constant 0 : i32
    return %c0_i32, %c0_i32_0 : i32, i32
  }
}

</mosaic_0001>

<bundles_post_ra>
// kernel: tpu_custom_call.1
= control target key start
LH: loop header
LB: loop body
LE: loop exit
PB: predicated region body
PF: predicated region fallthrough
CT: control target
= control target key end

     0   :  { %7 = vsyncpa [#allocation5], 0  ;;  %s429_s0 = inlined_call_operand.hbm [shape: bf16[8,128], index: 0, kind: input, shape index: {}]   ;;  %s430_s1 = inlined_call_operand.hbm [shape: bf16[8,128], index: 1, kind: input, shape index: {}]   ;;  %s431_s2 = inlined_call_operand.hbm [shape: f32[1,128], index: 2, kind: output, shape index: {}]  }
   0x1   :  { %8 = vsyncpa [#allocation8], 0 }
   0x2   :  { %9 = vsyncpa [#allocation6], 0  ;;  %s362_s9 = smov [#allocation4]   ;;  %s363_s11 = smov [#allocation7]  }
   0x3   :  { %s16_s10 = sshll.u32 %s362_s9, 4  ;;  %s26_s12 = sshll.u32 %s363_s11, 4  ;;  %s17_s10 = int_to_ptr.vmem [resolvable:$true] %s16_s10  ;;  %s27_s12 = int_to_ptr.vmem [resolvable:$true] %s26_s12 }
   0x4   :  { %s290_s15 = scalar_lea.hbm %s429_s0, 64 }
   0x5   :  { %p291_p0 = scmp.ne.s32.totalorder %s429_s0, %s290_s15  ;;  %p294_p1 = scmp.lt.u32.totalorder %s290_s15, %s429_s0 }
   0x7   :  { %p296_p2 = pnand %p294_p1, %p291_p0 }
   0x9   :  { %299 = shalt.err (!%p296_p2)
}
   0xa   :  { %s300_s20 = scalar_lea.vmem %s17_s10, 64  ;;  %p305_p4 = scmp.lt.s32.totalorder %s17_s10, %s17_s10 }
   0xb   :  { %p301_p3 = scmp.ne.s32.totalorder %s17_s10, %s300_s20  ;;  %p306_p5 = scmp.lt.s32.totalorder %s300_s20, %s300_s20 }
   0xd   :  { %p307_p6 = por %p306_p5, %p305_p4 }
   0xf   :  { %p308_p7 = pnand %p307_p6, %p301_p3 }
  0x11   :  { %311 = shalt.err (!%p308_p7)
}
  0x12   :  { %19 = dma.hbm_to_vmem [thread:$0]  %s429_s0, 64, %s17_s10, [#allocation5]  }
  0x13   :  { %s312_s25 = scalar_lea.hbm %s430_s1, 64 }
  0x14   :  { %p313_p8 = scmp.ne.s32.totalorder %s430_s1, %s312_s25  ;;  %p316_p9 = scmp.lt.u32.totalorder %s312_s25, %s430_s1 }
  0x16   :  { %p318_p10 = pnand %p316_p9, %p313_p8 }
  0x18   :  { %321 = shalt.err (!%p318_p10)
}
  0x19   :  { %s322_s30 = scalar_lea.vmem %s27_s12, 64  ;;  %p327_p12 = scmp.lt.s32.totalorder %s27_s12, %s27_s12 }
  0x1a   :  { %p323_p11 = scmp.ne.s32.totalorder %s27_s12, %s322_s30  ;;  %p328_p13 = scmp.lt.s32.totalorder %s322_s30, %s322_s30 }
  0x1c   :  { %p329_p0 = por %p328_p13, %p327_p12 }
  0x1e   :  { %p330_p1 = pnand %p329_p0, %p323_p11 }
  0x20   :  { %333 = shalt.err (!%p330_p1)
}
  0x21   :  { %29 = dma.hbm_to_vmem [thread:$0]  %s430_s1, 64, %s27_s12, [#allocation8]  }
  0x22   :  { %356 = dma.done.wait [#allocation5], 64  }
  0x23   :  { %357 = vsyncadd [#allocation5], 4294967232 }
  0x24   :  { %358 = dma.done.wait [#allocation8], 64  }
  0x25   :  { %359 = vsyncadd [#allocation8], 4294967232  ;;  %vm41_vm0 = vcmask 64512   ;;  %v364_v0 = vmov 0.0   ;;  %vm365_vm1 = vmmov 0   ;;  %vm217_vm2 = vcmask 57344  }
  0x26   :  { %42 = vst.msk [vmem:[#allocation2] sm:$0xff] %vm41_vm0, %v364_v0  ;;  %43 = vst.msk [vmem:[#allocation3] sm:$0xff] %vm41_vm0, %v364_v0  ;;  %261 = vmatprep.subr.bf16.mxu0 %v364_v0  ;;  %263 = vmatprep.mubr.msk.bf16.mxu0 %vm365_vm1, %v364_v0  ;;  %v45_v1 = vld [vmem:[#allocation7] sm:$0xf]  ;;  %v44_v2 = vld [vmem:[#allocation4] sm:$0xf] }
  0x27   :  { %91 = vmatprep.subr.bf16.mxu1 %v45_v1  ;;  %262 = vmatpush3.bf16.xpose.msra.mxu0 %v45_v1  ;;  %vm202_vm3 = vcmask 7168   ;;  %s366_s14 = smov [#allocation9]  }
  0x28   :  { %92 = vmatpush1.bf16.xpose.msra.mxu1 %v44_v2  ;;  %123 = vmatprep.mubr.bf16.mxu1 %v45_v1  ;;  %s249_s15 = sshll.u32 %s366_s14, 4  ;;  %s250_s15 = int_to_ptr.vmem [resolvable:$true] %s249_s15 }
  0x29   :  { %s334_s16 = scalar_lea.vmem %s250_s15, 16  ;;  %s338_s17 = scalar_lea.vmem %s250_s15, 32 }
  0x2a   :  { %p335_p2 = scmp.ne.s32.totalorder %s250_s15, %s334_s16  ;;  %p339_p3 = scmp.lt.s32.totalorder %s250_s15, %s250_s15 }
  0x2b   :  { %p340_p4 = scmp.lt.s32.totalorder %s338_s17, %s334_s16 }
  0x2d   :  { %v46_v3 = vld [vmem:[#allocation2] sm:$0xff]  ;;  %v90_v4 = vld [vmem:[#allocation3] sm:$0xff]  ;;  %p341_p5 = por %p340_p4, %p339_p3 }
  0x2e   :  { %264 = vmatmul.mubr.bf16.vlgmr.msra.gmra.mrb[0].mxu0 %v44_v2 }
  0x2f   :  { %124 = vmatmul.mubr.bf16.vlgmr.msra.gmra.mrb[0].mxu1 %v44_v2  ;;  %p342_p6 = pnand %p341_p5, %p335_p2 }
 0x101   :  { %v81_v5 = vpop.f32.mrb[0].mxu0 }
 0x102   :  { %v125_v6 = vpop.f32.mrb[0].mxu1  ;;  %v87_v7 = vadd.f32 %v81_v5, %v46_v3  ;;  %v265_v8 = vpop.f32.mrb[1].mxu0 }
 0x103   :  { %v131_v9 = vadd.f32 %v125_v6, %v90_v4  ;;  %v127_v10 = vpop.f32.mrb[1].mxu1  ;;  %v84_v11 = vpop.f32.mrb[2].mxu0 }
 0x104   :  { %v128_v12 = vpop.f32.mrb[2].mxu1  ;;  %89 = vst.msk [vmem:[#allocation2] sm:$0xff] %vm41_vm0, %v87_v7  ;;  %v266_v13 = vpop.f32.mrb[3].mxu0 }
 0x105   :  { %132 = vst.msk [vmem:[#allocation3] sm:$0xff] %vm41_vm0, %v131_v9  ;;  %v129_v14 = vpop.f32.mrb[3].mxu1 }
 0x10b   :  { %v136_v17 = vld [vmem:[#allocation2] sm:$0xff] }
 0x10c   :  { %v137_v15 = vld [vmem:[#allocation3] sm:$0xff]  ;;  %v150_v19 = vsel %vm41_vm0, %v136_v17, -inf }
 0x10d   :  { %v138_v16 = vmul.f32 0.5, %v137_v15  ;;  %v162_v30 = vrot.slane %v150_v19, 4 }
 0x10f   :  { %v139_v18 = vsel %vm41_vm0, %v138_v16, -inf  ;;  %v163_v31 = vmax.f32 %v150_v19, %v162_v30 }
 0x110   :  { %140 = vmax.xlane.f32.xlu0 %v139_v18 }
 0x111   :  { %v164_v32 = vrot.slane %v163_v31, 2 }
 0x113   :  { %v165_v33 = vmax.f32 %v163_v31, %v164_v32 }
 0x114   :  { %151 = vmax.xlane.f32.xlu0 %v150_v19 }
 0x115   :  { %v166_v34 = vrot.slane %v165_v33, 1 }
 0x117   :  { %v167_v35 = vmax.f32 %v165_v33, %v166_v34 }
 0x119   :  { %v168_v36 = vsub.f32 %v136_v17, %v167_v35 }
 0x11b   :  { %v169_v37 = vmul.f32 1.442695, %v168_v36 }
 0x19d   :  { %v141_v20 = vpop.xlane.xlu0 %140 }
 0x19e   :  { %v142_v21 = vsub.f32 %v138_v16, %v141_v20 }
 0x1a0   :  { %v143_v22 = vmul.f32 1.442695, %v142_v21 }
 0x1a1   :  { %v152_v23 = vpop.xlane.xlu0 %151 }
 0x1a2   :  { %278 = vpow2.f32 %v143_v22  ;;  %v153_v24 = vsub.f32 %v136_v17, %v152_v23 }
 0x1a4   :  { %v154_v25 = vmul.f32 1.442695, %v153_v24 }
 0x1a6   :  { %280 = vpow2.f32 %v154_v25 }
 0x1a7   :  { %282 = vpow2.f32 %v169_v37 }
 0x1ac   :  { %v279_v26 = vpop.eup %278 }
 0x1ad   :  { %v145_v27 = vsel %vm41_vm0, %v279_v26, 0.0 }
 0x1ae   :  { %146 = vadd.xlane.f32.xlu1 %v145_v27  ;;  %v233_v27 = vlaneseq }
 0x1b0   :  { %v281_v28 = vpop.eup %280 }
 0x1b1   :  { %v156_v29 = vsel %vm41_vm0, %v281_v28, 0.0  ;;  %v283_v38 = vpop.eup %282  ;;  %v234_v28 = vand.u32 127, %v233_v27 }
 0x1b2   :  { %157 = vadd.xlane.f32.xlu1 %v156_v29  ;;  %v171_v39 = vsel %vm41_vm0, %v283_v38, 0.0 }
 0x1b3   :  { %v172_v40 = vrot.slane %v171_v39, 4  ;;  %vm236_vm4 = vcmp.eq.s32.totalorder %v234_v28, 1  ;;  %vm235_vm5 = vcmp.eq.s32.totalorder %v234_v28, 0 }
 0x1b5   :  { %v173_v41 = vadd.f32 %v172_v40, %v171_v39 }
 0x1b7   :  { %v174_v42 = vrot.slane %v173_v41, 2 }
 0x1b9   :  { %v175_v43 = vadd.f32 %v174_v42, %v173_v41 }
 0x1bb   :  { %v176_v45 = vrot.slane %v175_v43, 1 }
 0x1bd   :  { %v177_v46 = vadd.f32 %v176_v45, %v175_v43 }
 0x23b   :  { %v147_v44 = vpop.xlane.xlu1 %146 }
 0x23c   :  { %284 = vrcp.f32 %v147_v44 }
 0x23d   :  { %286 = vlog2.f32 %v177_v46 }
 0x23f   :  { %v158_v63 = vpop.xlane.xlu1 %157 }
 0x240   :  { %288 = vlog2.f32 %v158_v63 }
 0x246   :  { %v285_v47 = vpop.eup %284 }
 0x247   :  { %v149_v48 = vmul.f32 %v285_v47, %v279_v26  ;;  %v287_v54 = vpop.eup %286 }
 0x248   :  { %v179_v57 = vmul.f32 0.6931472, %v287_v54 }
 0x249   :  { %v192_v49 = vsel %vm41_vm0, %v149_v48, 0.0  ;;  %v181_v50 = vmul.f32 %v149_v48, %v136_v17 }
 0x24a   :  { %v195_v51 = vrot.slane %v192_v49, 4  ;;  %193 = vadd.xlane.f32.xlu0 %v192_v49  ;;  %v180_v59 = vadd.f32 %v179_v57, %v167_v35  ;;  %v289_v0 = vpop.eup %288 }
 0x24b   :  { %v182_v52 = vsel %vm41_vm0, %v181_v50, 0.0  ;;  %v160_v1 = vmul.f32 0.6931472, %v289_v0 }
 0x24c   :  { %v196_v53 = vadd.f32 %v195_v51, %v192_v49  ;;  %183 = vadd.xlane.f32.xlu1 %v182_v52 }
 0x24d   :  { %v161_v2 = vadd.f32 %v160_v1, %v152_v23 }
 0x24e   :  { %v197_v55 = vrot.slane %v196_v53, 2 }
 0x250   :  { %v198_v56 = vadd.f32 %v197_v55, %v196_v53 }
 0x252   :  { %v199_v58 = vrot.slane %v198_v56, 1 }
 0x254   :  { %v200_v60 = vadd.f32 %v199_v58, %v198_v56 }
 0x256   :  { %v216_v61 = vmul.f32 %v200_v60, %v180_v59 }
 0x258   :  { %v218_v62 = vsel %vm217_vm2, %v216_v61, 0.0 }
 0x259   :  { %219 = vadd.xlane.f32.xlu1 %v218_v62 }
 0x2d7   :  { %v194_v3 = vpop.xlane.xlu0 %193 }
 0x2d8   :  { %v201_v4 = vmul.f32 %v194_v3, %v161_v2 }
 0x2d9   :  { %v184_v5 = vpop.xlane.xlu1 %183 }
 0x2da   :  { %v185_v6 = vrot.slane %v184_v5, 4  ;;  %v203_v7 = vsel %vm202_vm3, %v201_v4, 0.0 }
 0x2db   :  { %204 = vadd.xlane.f32.xlu0 %v203_v7 }
 0x2dc   :  { %v186_v8 = vadd.f32 %v185_v6, %v184_v5 }
 0x2de   :  { %v187_v9 = vrot.slane %v186_v8, 2 }
 0x2e0   :  { %v188_v10 = vadd.f32 %v187_v9, %v186_v8 }
 0x2e2   :  { %v189_v11 = vrot.slane %v188_v10, 1 }
 0x2e4   :  { %v190_v12 = vadd.f32 %v189_v11, %v188_v10 }
 0x2e6   :  { %267 = vpush %v190_v12  ;;  %v220_v13 = vpop.xlane.xlu1 %219 }
 0x2e7   :  { %v221_v14 = vrot.slane %v220_v13, 4 }
 0x2e9   :  { %v222_v15 = vadd.f32 %v221_v14, %v220_v13 }
 0x2eb   :  { %v223_v16 = vrot.slane %v222_v15, 2 }
 0x2ed   :  { %v224_v20 = vadd.f32 %v223_v16, %v222_v15 }
 0x2ef   :  { %v225_v23 = vrot.slane %v224_v20, 1 }
 0x2f1   :  { %v226_v26 = vadd.f32 %v225_v23, %v224_v20 }
 0x317   :  { %s268_s1 = spop %267 }
 0x368   :  { %v205_v17 = vpop.xlane.xlu0 %204 }
 0x369   :  { %v206_v18 = vrot.slane %v205_v17, 4 }
 0x36b   :  { %v207_v19 = vadd.f32 %v206_v18, %v205_v17 }
 0x36d   :  { %v208_v21 = vrot.slane %v207_v19, 2 }
 0x36f   :  { %v209_v22 = vadd.f32 %v208_v21, %v207_v19 }
 0x371   :  { %v210_v24 = vrot.slane %v209_v22, 1 }
 0x373   :  { %v211_v25 = vadd.f32 %v210_v24, %v209_v22 }
 0x375   :  { %269 = vpush %v211_v25 }
 0x376   :  { %271 = vpush %v226_v26 }
 0x3a6   :  { %s270_s4 = spop %269 }
 0x3a7   :  { %s213_s5 = ssub.f32 %s268_s1, %s270_s4  ;;  %s272_s6 = spop %271 }
 0x3a8   :  { %s228_s7 = ssub.f32 %s268_s1, %s272_s6 }
 0x3a9   :  { %s214_s8 = ssub.f32 0.0, %s213_s5 }
 0x3aa   :  { %s229_s9 = ssub.f32 0.0, %s228_s7 }
 0x3ab   :  { %s215_s10 = smul.f32 0.125, %s214_s8 }
 0x3ac   :  { %s230_s11 = smul.f32 0.125, %s229_s9 }
 0x3ad   :  { %v240_v31 = vstv %s215_s10 }
 0x3ae   :  { %s231_s12 = sadd.f32 %s230_s11, %s215_s10  ;;  %v237_v29 = vstv %s230_s11 }
 0x3b0   :  { %s232_s13 = smul.f32 0.5, %s231_s12 }
 0x3b2   :  { %v238_v30 = vstv %s232_s13 }
 0x3b3   :  { %v239_v32 = vsel %vm236_vm4, %v237_v29, %v238_v30 }
 0x3b4   :  { %v241_v33 = vsel %vm235_vm5, %v240_v31, %v239_v32 }
 0x3b5   :  { %242 = vst [vmem:[#allocation9] sm:$0x1] %v241_v33 }
 0x3b6   :  { %345 = shalt.err (!%p342_p6)
}
 0x3b7   :  { %s346_s20 = scalar_lea.hbm %s431_s2, 16 }
 0x3b8   :  { %p347_p7 = scmp.ne.s32.totalorder %s431_s2, %s346_s20  ;;  %p350_p8 = scmp.lt.u32.totalorder %s346_s20, %s431_s2 }
 0x3ba   :  { %p352_p9 = pnand %p350_p8, %p347_p7 }
 0x3bc   :  { %355 = shalt.err (!%p352_p9)
}
 0x3bd   :  { %252 = dma.vmem_to_hbm [thread:$0]  %s250_s15, 16, %s431_s2, [#allocation6]  }
 0x3be   :  { %360 = dma.done.wait [#allocation6], 16  }
 0x3bf   :  { %361 = vsyncadd [#allocation6], 4294967280 }
 0x3c0   :  { %256 = vsyncpa [#allocation5], 1 }
 0x3c1   :  { %257 = vsyncpa [#allocation8], 1 }
 0x3c2   :  { %258 = vsyncpa [#allocation6], 1 }

</bundles_post_ra>
